<compile_context>
chip_gen: v5e
topology: v5e:2x2
jax: 0.10.0
libtpu: 0.0.40
codegen_flags: <defaults>
</compile_context>

<pallas_src>
import math

import jax
import jax.numpy as jnp
from jax import lax
from jax.experimental import pallas as pl
from jax.experimental.pallas import tpu as pltpu

_NEG_INF = -1000000000.0  # matches the reference masked_fill value


def _pick_tile(n, candidates=(256, 128)):
    for c in candidates:
        if n % c == 0:
            return c
    return n  # full (untiled) dimension — only hit for small dims after padding


def _pad_to_multiple(x, axis, mult=128):
    """Zero-pad `axis` up to a multiple of `mult` (only when > mult and not
    already a multiple) so blocks stay (8,128)-friendly and VMEM-bounded."""
    n = x.shape[axis]
    if n <= mult or n % mult == 0:
        return x
    widths = [(0, 0)] * x.ndim
    widths[axis] = (0, (-n) % mult)
    return jnp.pad(x, widths)


# ----------------------------------------------------------------------------
# Fused linear: y_i = x @ W_i + b_i for several weights in ONE pallas_call.
# ----------------------------------------------------------------------------
def _make_fused_linear_kernel(n):
    def kernel(*refs):
        x_ref = refs[0]
        w_refs = refs[1:1 + n]
        b_refs = refs[1 + n:1 + 2 * n]
        o_refs = refs[1 + 2 * n:]
        x = x_ref[...]                      # x tile loaded once, reused for all dots
        for w_ref, b_ref, o_ref in zip(w_refs, b_refs, o_refs):
            y = jnp.dot(x, w_ref[...], preferred_element_type=jnp.float32)
            o_ref[...] = (y + b_ref[...].astype(jnp.float32)).astype(o_ref.dtype)
    return kernel


def fused_linear(x2d, wts, biases):
    """x2d: (M, Din); wts[i]: (Din, Dout) already transposed; biases[i]: (Dout,).

    Returns a tuple of (M, Dout) arrays (nn.Linear semantics)."""
    M0, Din = x2d.shape
    n = len(wts)
    Dout = wts[0].shape[1]
    assert all(w.shape == (Din, Dout) for w in wts)

    x2d = _pad_to_multiple(x2d, 0, 128)
    M = x2d.shape[0]
    tm = _pick_tile(M, (256, 128))

    # Tile Dout only when the fused, double-buffered weight blocks would stress
    # scoped VMEM; otherwise keep full-width weights so each is DMA'd once.
    w_bytes = sum(int(w.size) * w.dtype.itemsize for w in wts)
    tn = Dout if 2 * w_bytes <= 8 * 2**20 else _pick_tile(Dout, (512, 256, 128))

    # Dout tiles outer, M tiles inner -> weight/bias blocks stay resident across
    # the whole inner M sweep (no re-fetch), x is the only re-read input.
    grid = (Dout // tn, M // tm)

    in_specs = [pl.BlockSpec((tm, Din), lambda j, i: (i, 0))]
    in_specs += [pl.BlockSpec((Din, tn), lambda j, i: (0, j)) for _ in wts]
    in_specs += [pl.BlockSpec((1, tn), lambda j, i: (0, j)) for _ in wts]
    out_specs = tuple(pl.BlockSpec((tm, tn), lambda j, i: (i, j)) for _ in wts)
    out_shape = tuple(jax.ShapeDtypeStruct((M, Dout), x2d.dtype) for _ in wts)

    res = pl.pallas_call(
        _make_fused_linear_kernel(n),
        out_shape=out_shape,
        grid_spec=pltpu.PrefetchScalarGridSpec(
            num_scalar_prefetch=0,
            grid=grid,
            in_specs=in_specs,
            out_specs=out_specs,
        ),
        compiler_params=pltpu.CompilerParams(
            dimension_semantics=("parallel", "parallel")),
    )(x2d, *wts, *(b.reshape(1, -1) for b in biases))
    res = tuple(res) if isinstance(res, (tuple, list)) else (res,)
    if M != M0:
        res = tuple(r[:M0] for r in res)
    return res


# ----------------------------------------------------------------------------
# Flash attention (hot path): online softmax, no (Sq, Sk) HBM round-trip.
# The 1/sqrt(d_k) scale is pre-folded into W_Q, so no per-step score scaling.
# ----------------------------------------------------------------------------
def _flash_attention_kernel(q_ref, k_ref, v_ref, m_ref, o_ref,
                            m_sc, l_sc, acc_sc):
    ki = pl.program_id(3)

    @pl.when(ki == 0)
    def _():
        m_sc[...] = jnp.full_like(m_sc, -jnp.inf)
        l_sc[...] = jnp.zeros_like(l_sc)
        acc_sc[...] = jnp.zeros_like(acc_sc)

    # Contract the last dims directly; no K transpose is materialized.
    s = lax.dot_general(q_ref[...], k_ref[...], (((1,), (1,)), ((), ())),
                        preferred_element_type=jnp.float32)
    s = jnp.where(m_ref[...] == 0, jnp.float32(_NEG_INF), s)

    m_prev = m_sc[...]
    m_new = jnp.maximum(m_prev, jnp.max(s, axis=-1, keepdims=True))
    alpha = jnp.exp(m_prev - m_new)
    p = jnp.exp(s - m_new)
    l_sc[...] = alpha * l_sc[...] + jnp.sum(p, axis=-1, keepdims=True)
    acc_sc[...] = alpha * acc_sc[...] + jnp.dot(
        p.astype(v_ref.dtype), v_ref[...], preferred_element_type=jnp.float32)
    m_sc[...] = m_new

    @pl.when(ki == pl.num_programs(3) - 1)
    def _():
        l = l_sc[...]
        r = pl.reciprocal(l, approx=True)   # EUP slot (cheap)
        r = r * (2.0 - l * r)               # one Newton step -> ~f32 accuracy
        o_ref[...] = (acc_sc[...] * r).astype(o_ref.dtype)


def flash_attention(q_arr, k_arr, v_arr, mask4, *, num_heads, d_k):
    """q_arr: (B, Sq, H*d_k); k_arr/v_arr: (B, Sk, d_k); mask4: (mb, mh, Sq, Sk)
    int8 with mb in {1, B}, mh in {1, H}.  Returns (B, Sq, H*d_k)."""
    B, Sq = q_arr.shape[0], q_arr.shape[1]
    Sk = k_arr.shape[1]

    # Pad to 128-multiples (padded keys are masked out; padded query rows are
    # sliced away) instead of falling back to whole-array blocks.
    q_p = _pad_to_multiple(q_arr, 1)
    k_p = _pad_to_multiple(k_arr, 1)
    v_p = _pad_to_multiple(v_arr, 1)
    m_p = _pad_to_multiple(_pad_to_multiple(mask4, 2), 3)
    Sq_p, Sk_p = q_p.shape[1], k_p.shape[1]
    mb, mh = m_p.shape[0], m_p.shape[1]

    tq = _pick_tile(Sq_p, (256, 128))
    tk = _pick_tile(Sk_p, (256, 128))

    q_map = lambda b, h, qi, ki: (b, qi, h)          # head split via column block
    kv_map = lambda b, h, qi, ki: (b, ki, 0)         # single KV head (reference view)
    m_map = lambda b, h, qi, ki: (b if mb > 1 else 0, h if mh > 1 else 0, qi, ki)
    o_map = lambda b, h, qi, ki: (b, qi, h)          # head merge folded into out_spec

    out = pl.pallas_call(
        _flash_attention_kernel,
        out_shape=jax.ShapeDtypeStruct((B, Sq_p, num_heads * d_k), q_arr.dtype),
        grid_spec=pltpu.PrefetchScalarGridSpec(
            num_scalar_prefetch=0,
            grid=(B, num_heads, Sq_p // tq, Sk_p // tk),
            in_specs=[
                pl.BlockSpec((None, tq, d_k), q_map),
                pl.BlockSpec((None, tk, d_k), kv_map),
                pl.BlockSpec((None, tk, d_k), kv_map),
                pl.BlockSpec((None, None, tq, tk), m_map),     # int8 mask tile
            ],
            out_specs=pl.BlockSpec((None, tq, d_k), o_map),
            scratch_shapes=[
                pltpu.VMEM((tq, 1), jnp.float32),     # running max
                pltpu.VMEM((tq, 1), jnp.float32),     # running sum
                pltpu.VMEM((tq, d_k), jnp.float32),   # running accumulator
            ],
        ),
        compiler_params=pltpu.CompilerParams(
            dimension_semantics=("parallel", "parallel", "parallel", "arbitrary")),
    )(q_p, k_p, v_p, m_p)
    return out[:, :Sq] if Sq_p != Sq else out


# ----------------------------------------------------------------------------
# Optional inspection path: also materializes softmax probs (off the hot path).
# Tiled over the query axis so the (tq, Sk) probs block stays VMEM-bounded.
# ----------------------------------------------------------------------------
def _attention_probs_kernel(q_ref, k_ref, v_ref, m_ref, o_ref, p_ref):
    s = lax.dot_general(q_ref[...], k_ref[...], (((1,), (1,)), ((), ())),
                        preferred_element_type=jnp.float32)
    s = jnp.where(m_ref[...] == 0, jnp.float32(_NEG_INF), s)
    s = s - jnp.max(s, axis=-1, keepdims=True)
    e = jnp.exp(s)
    denom = jnp.sum(e, axis=-1, keepdims=True)
    r = pl.reciprocal(denom, approx=True)
    r = r * (2.0 - denom * r)
    p = e * r
    p_ref[...] = p.astype(p_ref.dtype)
    o_ref[...] = jnp.dot(p.astype(v_ref.dtype), v_ref[...],
                         preferred_element_type=jnp.float32).astype(o_ref.dtype)


def attention_with_probs(q_arr, k_arr, v_arr, mask4, *, num_heads, d_k):
    B, Sq = q_arr.shape[0], q_arr.shape[1]
    Sk = k_arr.shape[1]

    q_p = _pad_to_multiple(q_arr, 1)
    k_p = _pad_to_multiple(k_arr, 1)
    v_p = _pad_to_multiple(v_arr, 1)
    m_p = _pad_to_multiple(_pad_to_multiple(mask4, 2), 3)
    Sq_p, Sk_p = q_p.shape[1], k_p.shape[1]
    mb, mh = m_p.shape[0], m_p.shape[1]

    tq = _pick_tile(Sq_p, (256, 128))

    q_map = lambda b, h, qi: (b, qi, h)
    kv_map = lambda b, h, qi: (b, 0, 0)
    m_map = lambda b, h, qi: (b if mb > 1 else 0, h if mh > 1 else 0, qi, 0)
    p_map = lambda b, h, qi: (b, h, qi, 0)

    out, probs = pl.pallas_call(
        _attention_probs_kernel,
        out_shape=(jax.ShapeDtypeStruct((B, Sq_p, num_heads * d_k), q_arr.dtype),
                   jax.ShapeDtypeStruct((B, num_heads, Sq_p, Sk_p), jnp.float32)),
        grid_spec=pltpu.PrefetchScalarGridSpec(
            num_scalar_prefetch=0,
            grid=(B, num_heads, Sq_p // tq),
            in_specs=[
                pl.BlockSpec((None, tq, d_k), q_map),
                pl.BlockSpec((None, Sk_p, d_k), kv_map),
                pl.BlockSpec((None, Sk_p, d_k), kv_map),
                pl.BlockSpec((None, None, tq, Sk_p), m_map),
            ],
            out_specs=(
                pl.BlockSpec((None, tq, d_k), q_map),
                pl.BlockSpec((None, None, tq, Sk_p), p_map),
            ),
        ),
        compiler_params=pltpu.CompilerParams(
            dimension_semantics=("parallel", "parallel", "parallel")),
    )(q_p, k_p, v_p, m_p)
    if Sq_p != Sq or Sk_p != Sk:
        out = out[:, :Sq]
        probs = probs[:, :, :Sq, :Sk]
    return out, probs


def _normalize_mask(mask, B, H, Sq, Sk):
    """Return mask as (mb, mh, Sq, Sk) int8 WITHOUT broadcasting over B*H."""
    if mask is None:
        return jnp.ones((1, 1, Sq, Sk), jnp.int8)
    m = jnp.asarray(mask)
    while m.ndim < 4:
        m = m[None]
    mb = B if m.shape[0] != 1 else 1
    mh = H if m.shape[1] != 1 else 1
    m = jnp.broadcast_to(m, (mb, mh, Sq, Sk))
    return (m != 0).astype(jnp.int8)   # exact masked_fill(mask == 0) semantics


# ----------------------------------------------------------------------------
# Module wrapper mirroring the PyTorch forward.
# ----------------------------------------------------------------------------
class MultiHeadAttentionBlock:
    def __init__(self, d_model: int, h: int, dropout: float, key,
                 store_attention_scores: bool = False, dtype=jnp.float32):
        assert d_model % h == 0, "d_model should be divisible by h"
        self.d_model = d_model
        self.h = h
        self.d_k = d_model // h
        self.dropout_p = dropout  # TODO(synk): nn.Dropout on attention probs not applied (p=0.0 / eval mode).
        self.store_attention_scores = store_attention_scores
        self.attention_scores = None
        self.dtype = dtype        # compute dtype: bf16 here -> bf16 MXU path

        keys = jax.random.split(key, 8)

        def init_linear(kw, kb, fan_in, fan_out):
            bound = 1.0 / math.sqrt(fan_in)  # nn.Linear default init
            w = jax.random.uniform(kw, (fan_out, fan_in), jnp.float32, -bound, bound)
            b = jax.random.uniform(kb, (fan_out,), jnp.float32, -bound, bound)
            return w, b

        # PyTorch-layout parameters (kept for the pure-JAX reference).
        self.W_Q = init_linear(keys[0], keys[1], d_model, d_model)
        self.W_K = init_linear(keys[2], keys[3], d_model, d_model)
        self.W_V = init_linear(keys[4], keys[5], d_model, d_model)
        self.W_O = init_linear(keys[6], keys[7], d_model, d_model)

        # Kernel-layout params: transposed to (Din, Dout), the 1/sqrt(d_k)
        # softmax scale folded into W_Q / b_Q (removes a per-step score mul),
        # cast once to the compute dtype — all hoisted out of the forward.
        scale = 1.0 / math.sqrt(self.d_k)
        self.Wq_t = (self.W_Q[0].T * scale).astype(dtype)
        self.bq = (self.W_Q[1] * scale).astype(dtype)
        self.Wk_t = self.W_K[0].T.astype(dtype)
        self.bk = self.W_K[1].astype(dtype)
        self.Wv_t = self.W_V[0].T.astype(dtype)
        self.bv = self.W_V[1].astype(dtype)
        self.Wo_t = self.W_O[0].T.astype(dtype)
        self.bo = self.W_O[1].astype(dtype)

    def __call__(self, query, key, value, mask):
        B, Sq, D = query.shape
        Sk = key.shape[1]
        H, dk = self.h, self.d_k
        if dk != D:
            # Mirrors the reference: key/value.view(B, S, 1, d_k) requires d_k == d_model.
            raise ValueError("reference K/V view requires h == 1 (d_k == d_model)")

        # Fusion plan uses object identity BEFORE any casting so self-attention
        # keeps the single fused Q/K/V projection kernel. (Under jit, equal but
        # distinct tracers fall back to the un-fused path: perf-only.)
        same_qkv = (query is key) and (key is value)
        same_kv = key is value

        qx = query.astype(self.dtype).reshape(B * Sq, D)
        if same_qkv:
            q2, k2, v2 = fused_linear(qx, (self.Wq_t, self.Wk_t, self.Wv_t),
                                      (self.bq, self.bk, self.bv))
        elif same_kv:
            kx = key.astype(self.dtype).reshape(B * Sk, D)
            (q2,) = fused_linear(qx, (self.Wq_t,), (self.bq,))
            k2, v2 = fused_linear(kx, (self.Wk_t, self.Wv_t), (self.bk, self.bv))
        else:
            kx = key.astype(self.dtype).reshape(B * Sk, D)
            vx = value.astype(self.dtype).reshape(B * Sk, D)
            (q2,) = fused_linear(qx, (self.Wq_t,), (self.bq,))
            (k2,) = fused_linear(kx, (self.Wk_t,), (self.bk,))
            (v2,) = fused_linear(vx, (self.Wv_t,), (self.bv,))

        # Head split / merge is handled by BlockSpec index_maps inside the
        # attention call; no JAX-level transposes are needed here.
        q3 = q2.reshape(B, Sq, H * dk)
        k3 = k2.reshape(B, Sk, dk)
        v3 = v2.reshape(B, Sk, dk)
        mask4 = _normalize_mask(mask, B, H, Sq, Sk)

        if self.store_attention_scores:
            x, probs = attention_with_probs(q3, k3, v3, mask4, num_heads=H, d_k=dk)
            self.attention_scores = probs
        else:
            x = flash_attention(q3, k3, v3, mask4, num_heads=H, d_k=dk)
            self.attention_scores = None  # probs dropped from the hot path (perf)

        (out,) = fused_linear(x.reshape(B * Sq, H * dk), (self.Wo_t,), (self.bo,))
        return out.reshape(B, Sq, D)


# ----------------------------------------------------------------------------
# Pure-JAX reference for verification (mirrors the PyTorch code).
# ----------------------------------------------------------------------------
def ref_forward(mha, query, key, value, mask):
    def lin(x, wb):
        return x @ wb[0].T + wb[1]
    B, Sq, _ = query.shape
    Sk = key.shape[1]
    q = lin(query, mha.W_Q).reshape(B, Sq, mha.h, mha.d_k).transpose(0, 2, 1, 3)
    k = lin(key, mha.W_K).reshape(B, Sk, 1, mha.d_k).transpose(0, 2, 1, 3)
    v = lin(value, mha.W_V).reshape(B, Sk, 1, mha.d_k).transpose(0, 2, 1, 3)
    s = q @ jnp.swapaxes(k, -2, -1) / math.sqrt(mha.d_k)
    if mask is not None:
        s = jnp.where(mask == 0, _NEG_INF, s)
    p = jax.nn.softmax(s, axis=-1)
    x = (p @ v).transpose(0, 2, 1, 3).reshape(B, Sq, mha.h * mha.d_k)
    return lin(x, mha.W_O), p


if __name__ == "__main__":
    B, S, d_model, h = 2, 8, 32, 1  # h=1 required by the reference K/V view
    root = jax.random.PRNGKey(0)
    k_params, k_x, k_q, k_x2 = jax.random.split(root, 4)

    mha = MultiHeadAttentionBlock(d_model, h, dropout=0.0, key=k_params)

    x = jax.random.normal(k_x, (B, S, d_model), jnp.float32)
    mask = jnp.tril(jnp.ones((S, S), jnp.int32))[None, None]  # (1,1,S,S) causal

    # 1) self-attention, flash hot path (fused QKV projection).
    out = jax.block_until_ready(mha(x, x, x, mask))
    ref, ref_p = ref_forward(mha, x, x, x, mask)
    assert out.shape == (B, S, d_model)
    assert jnp.allclose(out, ref, rtol=1e-4, atol=1e-4), "mismatch vs reference (flash)"

    # 2) inspection path: materialized attention probs.
    mha.store_attention_scores = True
    out2 = jax.block_until_ready(mha(x, x, x, mask))
    assert jnp.allclose(out2, ref, rtol=1e-4, atol=1e-4), "mismatch vs reference (probs path)"
    assert jnp.allclose(mha.attention_scores, ref_p, rtol=1e-4, atol=1e-4), "probs mismatch"
    mha.store_attention_scores = False

    # 3) cross-attention (key is value, query differs) -> fused-KV projection path.
    q_in = jax.random.normal(k_q, (B, S, d_model), jnp.float32)
    out3 = jax.block_until_ready(mha(q_in, x, x, mask))
    ref3, _ = ref_forward(mha, q_in, x, x, mask)
    assert jnp.allclose(out3, ref3, rtol=1e-4, atol=1e-4), "mismatch vs reference (cross)"

    # 4) non-128-multiple sequence length -> exercises the padding/masking path.
    S2, D2 = 200, 128
    mha2 = MultiHeadAttentionBlock(D2, 1, dropout=0.0, key=k_params)
    x2 = jax.random.normal(k_x2, (B, S2, D2), jnp.float32)
    mask2 = jnp.tril(jnp.ones((S2, S2), jnp.int32))[None, None]
    out4 = jax.block_until_ready(mha2(x2, x2, x2, mask2))
    ref4, _ = ref_forward(mha2, x2, x2, x2, mask2)
    assert out4.shape == (B, S2, D2)
    assert jnp.allclose(out4, ref4, rtol=1e-4, atol=1e-4), "mismatch vs reference (padded)"

    # 5) bf16 compute path (bf16 MXU inputs; f32 accumulation & softmax math).
    mha_bf16 = MultiHeadAttentionBlock(d_model, h, dropout=0.0, key=k_params,
                                       dtype=jnp.bfloat16)
    out5 = jax.block_until_ready(mha_bf16(x, x, x, mask))
    assert jnp.allclose(out5.astype(jnp.float32), ref, rtol=1e-1, atol=1e-1), \
        "mismatch vs reference (bf16)"

    print("KERNEL_OK")
</pallas_src>

<mosaic_0001>
module attributes {stable_mosaic.version = 11 : i64} {
  func.func @kernel(%arg0: i32, %arg1: i32, %arg2: memref<16x32xf32, #tpu.memory_space<vmem>>, %arg3: memref<32x32xf32, #tpu.memory_space<vmem>>, %arg4: memref<32x32xf32, #tpu.memory_space<vmem>>, %arg5: memref<32x32xf32, #tpu.memory_space<vmem>>, %arg6: memref<1x32xf32, #tpu.memory_space<vmem>>, %arg7: memref<1x32xf32, #tpu.memory_space<vmem>>, %arg8: memref<1x32xf32, #tpu.memory_space<vmem>>, %arg9: memref<16x32xf32, #tpu.memory_space<vmem>>, %arg10: memref<16x32xf32, #tpu.memory_space<vmem>>, %arg11: memref<16x32xf32, #tpu.memory_space<vmem>>) attributes {dimension_semantics = [#tpu.dimension_semantics<parallel>, #tpu.dimension_semantics<parallel>], iteration_bounds = array<i64: 1, 1>, scalar_prefetch = 0 : i64, scratch_operands = 0 : i64, tpu.core_type = #tpu.core_type<tc>, window_params = [{transform_indices = @transform_0, window_bounds = array<i64: 16, 32>}, {transform_indices = @transform_1, window_bounds = array<i64: 32, 32>}, {transform_indices = @transform_2, window_bounds = array<i64: 32, 32>}, {transform_indices = @transform_3, window_bounds = array<i64: 32, 32>}, {transform_indices = @transform_4, window_bounds = array<i64: 1, 32>}, {transform_indices = @transform_5, window_bounds = array<i64: 1, 32>}, {transform_indices = @transform_6, window_bounds = array<i64: 1, 32>}, {transform_indices = @transform_7, window_bounds = array<i64: 16, 32>}, {transform_indices = @transform_8, window_bounds = array<i64: 16, 32>}, {transform_indices = @transform_9, window_bounds = array<i64: 16, 32>}]} {
    %c0 = arith.constant 0 : index
    %c0_0 = arith.constant 0 : index
    %0 = vector.load %arg2[%c0, %c0_0] : memref<16x32xf32, #tpu.memory_space<vmem>>, vector<16x32xf32>
    %c0_1 = arith.constant 0 : index
    %c0_2 = arith.constant 0 : index
    %1 = vector.load %arg3[%c0_1, %c0_2] : memref<32x32xf32, #tpu.memory_space<vmem>>, vector<32x32xf32>
    %cst = arith.constant dense<0.000000e+00> : vector<16x32xf32>
    %2 = tpu.matmul %0, %1, %cst {dimension_numbers = #tpu.dot_dimension_numbers<[1], [0], [0], [1], [0, 0, 1, 1], [], []>} : vector<16x32xf32>, vector<32x32xf32>, vector<16x32xf32> -> vector<16x32xf32>
    %c0_3 = arith.constant 0 : index
    %c0_4 = arith.constant 0 : index
    %3 = vector.load %arg6[%c0_3, %c0_4] : memref<1x32xf32, #tpu.memory_space<vmem>>, vector<1x32xf32>
    %4 = vector.broadcast %3 : vector<1x32xf32> to vector<16x32xf32>
    %5 = arith.addf %2, %4 : vector<16x32xf32>
    %c0_5 = arith.constant 0 : index
    %c0_6 = arith.constant 0 : index
    %6 = vector.load %arg9[%c0_5, %c0_6] : memref<16x32xf32, #tpu.memory_space<vmem>>, vector<16x32xf32>
    tpu.vector_store %arg9[%c0_5, %c0_6], %5 {strides = array<i32>} : memref<16x32xf32, #tpu.memory_space<vmem>>, vector<16x32xf32>,
    %c0_7 = arith.constant 0 : index
    %c0_8 = arith.constant 0 : index
    %7 = vector.load %arg4[%c0_7, %c0_8] : memref<32x32xf32, #tpu.memory_space<vmem>>, vector<32x32xf32>
    %cst_9 = arith.constant dense<0.000000e+00> : vector<16x32xf32>
    %8 = tpu.matmul %0, %7, %cst_9 {dimension_numbers = #tpu.dot_dimension_numbers<[1], [0], [0], [1], [0, 0, 1, 1], [], []>} : vector<16x32xf32>, vector<32x32xf32>, vector<16x32xf32> -> vector<16x32xf32>
    %c0_10 = arith.constant 0 : index
    %c0_11 = arith.constant 0 : index
    %9 = vector.load %arg7[%c0_10, %c0_11] : memref<1x32xf32, #tpu.memory_space<vmem>>, vector<1x32xf32>
    %10 = vector.broadcast %9 : vector<1x32xf32> to vector<16x32xf32>
    %11 = arith.addf %8, %10 : vector<16x32xf32>
    %c0_12 = arith.constant 0 : index
    %c0_13 = arith.constant 0 : index
    %12 = vector.load %arg10[%c0_12, %c0_13] : memref<16x32xf32, #tpu.memory_space<vmem>>, vector<16x32xf32>
    tpu.vector_store %arg10[%c0_12, %c0_13], %11 {strides = array<i32>} : memref<16x32xf32, #tpu.memory_space<vmem>>, vector<16x32xf32>,
    %c0_14 = arith.constant 0 : index
    %c0_15 = arith.constant 0 : index
    %13 = vector.load %arg5[%c0_14, %c0_15] : memref<32x32xf32, #tpu.memory_space<vmem>>, vector<32x32xf32>
    %cst_16 = arith.constant dense<0.000000e+00> : vector<16x32xf32>
    %14 = tpu.matmul %0, %13, %cst_16 {dimension_numbers = #tpu.dot_dimension_numbers<[1], [0], [0], [1], [0, 0, 1, 1], [], []>} : vector<16x32xf32>, vector<32x32xf32>, vector<16x32xf32> -> vector<16x32xf32>
    %c0_17 = arith.constant 0 : index
    %c0_18 = arith.constant 0 : index
    %15 = vector.load %arg8[%c0_17, %c0_18] : memref<1x32xf32, #tpu.memory_space<vmem>>, vector<1x32xf32>
    %16 = vector.broadcast %15 : vector<1x32xf32> to vector<16x32xf32>
    %17 = arith.addf %14, %16 : vector<16x32xf32>
    %c0_19 = arith.constant 0 : index
    %c0_20 = arith.constant 0 : index
    %18 = vector.load %arg11[%c0_19, %c0_20] : memref<16x32xf32, #tpu.memory_space<vmem>>, vector<16x32xf32>
    tpu.vector_store %arg11[%c0_19, %c0_20], %17 {strides = array<i32>} : memref<16x32xf32, #tpu.memory_space<vmem>>, vector<16x32xf32>,
    return
  }
  func.func @transform_0(%arg0: i32, %arg1: i32) -> (i32, i32) {
    %c0_i32 = arith.constant 0 : i32
    %c0_i32_0 = arith.constant 0 : i32
    return %arg1, %c0_i32 : i32, i32
  }
  func.func @transform_1(%arg0: i32, %arg1: i32) -> (i32, i32) {
    %c0_i32 = arith.constant 0 : i32
    %c0_i32_0 = arith.constant 0 : i32
    return %c0_i32, %arg0 : i32, i32
  }
  func.func @transform_2(%arg0: i32, %arg1: i32) -> (i32, i32) {
    %c0_i32 = arith.constant 0 : i32
    %c0_i32_0 = arith.constant 0 : i32
    return %c0_i32, %arg0 : i32, i32
  }
  func.func @transform_3(%arg0: i32, %arg1: i32) -> (i32, i32) {
    %c0_i32 = arith.constant 0 : i32
    %c0_i32_0 = arith.constant 0 : i32
    return %c0_i32, %arg0 : i32, i32
  }
  func.func @transform_4(%arg0: i32, %arg1: i32) -> (i32, i32) {
    %c0_i32 = arith.constant 0 : i32
    %c0_i32_0 = arith.constant 0 : i32
    return %c0_i32, %arg0 : i32, i32
  }
  func.func @transform_5(%arg0: i32, %arg1: i32) -> (i32, i32) {
    %c0_i32 = arith.constant 0 : i32
    %c0_i32_0 = arith.constant 0 : i32
    return %c0_i32, %arg0 : i32, i32
  }
  func.func @transform_6(%arg0: i32, %arg1: i32) -> (i32, i32) {
    %c0_i32 = arith.constant 0 : i32
    %c0_i32_0 = arith.constant 0 : i32
    return %c0_i32, %arg0 : i32, i32
  }
  func.func @transform_7(%arg0: i32, %arg1: i32) -> (i32, i32) {
    %c0_i32 = arith.constant 0 : i32
    return %arg1, %arg0 : i32, i32
  }
  func.func @transform_8(%arg0: i32, %arg1: i32) -> (i32, i32) {
    %c0_i32 = arith.constant 0 : i32
    return %arg1, %arg0 : i32, i32
  }
  func.func @transform_9(%arg0: i32, %arg1: i32) -> (i32, i32) {
    %c0_i32 = arith.constant 0 : i32
    return %arg1, %arg0 : i32, i32
  }
}

</mosaic_0001>

<bundles_post_ra>
// kernel: tpu_custom_call.1
= control target key start
LH: loop header
LB: loop body
LE: loop exit
PB: predicated region body
PF: predicated region fallthrough
CT: control target
= control target key end

     0   :  { %15 = vsyncpa [#allocation3], 0  ;;  %s580_s0 = inlined_call_operand.hbm [shape: f32[16,32], index: 0, kind: input, shape index: {}]   ;;  %s581_s1 = inlined_call_operand.hbm [shape: f32[32,32], index: 1, kind: input, shape index: {}]   ;;  %s582_s2 = inlined_call_operand.hbm [shape: f32[32,32], index: 2, kind: input, shape index: {}]   ;;  %s583_s3 = inlined_call_operand.hbm [shape: f32[32,32], index: 3, kind: input, shape index: {}]   ;;  %s584_s4 = inlined_call_operand.vmem [shape: f32[1,32], index: 4, kind: input, shape index: {}]   ;;  %s585_s5 = inlined_call_operand.vmem [shape: f32[1,32], index: 5, kind: input, shape index: {}]   ;;  %s586_s6 = inlined_call_operand.vmem [shape: f32[1,32], index: 6, kind: input, shape index: {}]   ;;  %s587_s7 = inlined_call_operand.hbm [shape: f32[16,32], index: 7, kind: output, shape index: {0}]   ;;  %s588_s8 = inlined_call_operand.hbm [shape: f32[16,32], index: 8, kind: output, shape index: {1}]   ;;  %s589_s9 = inlined_call_operand.hbm [shape: f32[16,32], index: 9, kind: output, shape index: {2}]  }
   0x1   :  { %16 = vsyncpa [#allocation6], 0 }
   0x2   :  { %17 = vsyncpa [#allocation9], 0 }
   0x3   :  { %18 = vsyncpa [#allocation4], 0 }
   0x4   :  { %19 = vsyncpa [#allocation12], 0  ;;  %s37_s11 = sshll.u32 %s581_s1, 4  ;;  %s458_s12 = smov [#allocation5]   ;;  %s38_s11 = int_to_ptr.hbm [resolvable:$true] %s37_s11 }
   0x5   :  { %s39_s13 = sshll.u32 %s458_s12, 4  ;;  %s24_s16 = sshll.u32 %s580_s0, 4  ;;  %s40_s13 = int_to_ptr.vmem [resolvable:$true] %s39_s13  ;;  %s25_s16 = int_to_ptr.hbm [resolvable:$true] %s24_s16 }
   0x6   :  { %s459_s17 = smov 128   ;;  %s460_s18 = smov 8  }
   0x7   :  { %45 = dma.hbm_to_vmem [thread:$0]  %s38_s11, 512, %s40_s13, [#allocation6], %s459_s17, %s459_s17, %s460_s18  }
   0x8   :  { %s461_s19 = smov [#allocation2]   ;;  %s50_s1 = sshll.u32 %s582_s2, 4  ;;  %s51_s1 = int_to_ptr.hbm [resolvable:$true] %s50_s1 }
   0x9   :  { %s26_s20 = sshll.u32 %s461_s19, 4  ;;  %s63_s24 = sshll.u32 %s583_s3, 4  ;;  %s27_s20 = int_to_ptr.vmem [resolvable:$true] %s26_s20  ;;  %s64_s24 = int_to_ptr.hbm [resolvable:$true] %s63_s24 }
   0xa   :  { %32 = dma.hbm_to_vmem [thread:$0]  %s25_s16, 256, %s27_s20, [#allocation3], %s459_s17, %s459_s17, %s460_s18  }
   0xb   :  { %s462_s25 = smov [#allocation7]   ;;  %s463_s27 = smov [#allocation8]  }
   0xc   :  { %s52_s26 = sshll.u32 %s462_s25, 4  ;;  %s65_s2 = sshll.u32 %s463_s27, 4  ;;  %s53_s26 = int_to_ptr.vmem [resolvable:$true] %s52_s26  ;;  %s66_s2 = int_to_ptr.vmem [resolvable:$true] %s65_s2 }
   0xd   :  { %58 = dma.hbm_to_vmem [thread:$0]  %s51_s1, 512, %s53_s26, [#allocation6], %s459_s17, %s459_s17, %s460_s18  }
   0xe   :  { %71 = dma.hbm_to_vmem [thread:$0]  %s64_s24, 512, %s66_s2, [#allocation9], %s459_s17, %s459_s17, %s460_s18  }
   0xf   :  { %448 = dma.done.wait [#allocation3], 256  }
  0x10   :  { %449 = vsyncadd [#allocation3], 4294967040 }
  0x11   :  { %450 = dma.done.wait [#allocation6], 1024  }
  0x12   :  { %451 = vsyncadd [#allocation6], 4294966272 }
  0x13   :  { %452 = dma.done.wait [#allocation9], 512  }
  0x14   :  { %453 = vsyncadd [#allocation9], 4294966784  ;;  %v172_v0 = vld [vmem:[#allocation8 + $0x18] sm:$0xff]  ;;  %v171_v1 = vld [vmem:[#allocation8 + $0x10] sm:$0xff]  ;;  %vm104_vm0 = vcmask 261120   ;;  %s464_s12 = smov [#allocation10]  }
  0x15   :  { %189 = vmatpush.msra.mxu2 %v172_v0  ;;  %v139_v2 = vld [vmem:[#allocation7 + $0x18] sm:$0xff]  ;;  %v138_v3 = vld [vmem:[#allocation7 + $0x10] sm:$0xff]  ;;  %v170_v4 = vld [vmem:[#allocation8 + $0x8] sm:$0xff]  ;;  %s206_s13 = sshll.u32 %s464_s12, 4  ;;  %s465_s16 = smov [#allocation11]   ;;  %s207_s13 = int_to_ptr.vmem [resolvable:$true] %s206_s13 }
  0x16   :  { %156 = vmatpush.msra.mxu1 %v139_v2  ;;  %v99_v5 = vld [vmem:[#allocation5 + $0x18] sm:$0xff]  ;;  %v169_v6 = vld [vmem:[#allocation8] sm:$0xff]  ;;  %v137_v7 = vld [vmem:[#allocation7 + $0x8] sm:$0xff]  ;;  %s219_s19 = sshll.u32 %s465_s16, 4  ;;  %s221_s21 = sshll.u32 %s588_s8, 4  ;;  %s220_s19 = int_to_ptr.vmem [resolvable:$true] %s219_s19  ;;  %s222_s21 = int_to_ptr.hbm [resolvable:$true] %s221_s21 }
  0x17   :  { %190 = vmatpush.msra.mxu2 %v171_v1  ;;  %264 = vmatpush.msra.mxu3 %v99_v5  ;;  %v98_v8 = vld [vmem:[#allocation5 + $0x10] sm:$0xff]  ;;  %v97_v10 = vld [vmem:[#allocation5 + $0x8] sm:$0xff]  ;;  %v136_v11 = vld [vmem:[#allocation7] sm:$0xff]  ;;  %s234_s8 = sshll.u32 %s589_s9, 4  ;;  %s235_s8 = int_to_ptr.hbm [resolvable:$true] %s234_s8 }
  0x18   :  { %157 = vmatpush.msra.mxu1 %v138_v3  ;;  %v94_v9 = vld [vmem:[#allocation2] sm:$0xff]  ;;  %123 = vmatpush.msra.mxu0 %v99_v5  ;;  %v96_v12 = vld [vmem:[#allocation5] sm:$0xff]  ;;  %v95_v13 = vld [vmem:[#allocation2 + $0x8] sm:$0xff] }
  0x19   :  { %191 = vmatpush.msra.mxu2 %v170_v4  ;;  %265 = vmatpush.msra.mxu3 %v98_v8  ;;  %v277_v14 = vld [vmem:[%s585_s5] ss:$0 sm:$0xff]  ;;  %s208_s5 = sshll.u32 %s587_s7, 4  ;;  %s209_s5 = int_to_ptr.hbm [resolvable:$true] %s208_s5 }
  0x1a   :  { %158 = vmatpush.msra.mxu1 %v137_v7  ;;  %124 = vmatpush.msra.mxu0 %v98_v8  ;;  %v279_v17 = vld [vmem:[%s584_s4] ss:$0 sm:$0xff] }
  0x1b   :  { %192 = vmatpush.msra.mxu2 %v169_v6  ;;  %266 = vmatpush.msra.mxu3 %v97_v10  ;;  %v278_v18 = vld [vmem:[%s586_s6] ss:$0 sm:$0xff]  ;;  %s466_s6 = smov [#allocation13]  }
  0x1c   :  { %262 = vmatmul.msk.f32.vlgmr.msra.gmra.mxu2 %vm104_vm0, %v94_v9  ;;  %159 = vmatpush.msra.mxu1 %v136_v11  ;;  %s232_s7 = sshll.u32 %s466_s6, 4  ;;  %s233_s7 = int_to_ptr.vmem [resolvable:$true] %s232_s7 }
  0x1d   :  { %260 = vmatmul.msk.f32.vlgmr.msra.gmra.mxu1 %vm104_vm0, %v94_v9  ;;  %267 = vmatpush.msra.mxu3 %v96_v12 }
  0x1e   :  { %259 = vmatmul.msk.f32.vlgmr.msra.gmra.mxu3 %vm104_vm0, %v95_v13  ;;  %125 = vmatpush.msra.mxu0 %v97_v10 }
  0x20   :  { %126 = vmatpush.msra.mxu0 %v96_v12 }
  0x21   :  { %258 = vmatmul.msk.f32.vlgmr.msra.gmra.mxu0 %vm104_vm0, %v94_v9 }
  0x24   :  { %263 = vmatmul.msk.f32.gmra.mxu2 %vm104_vm0, %v95_v13 }
  0x25   :  { %261 = vmatmul.msk.f32.gmra.mxu1 %vm104_vm0, %v95_v13 }
  0x9a   :  { %v161_v15 = vpop.f32.mrf.mxu1 }
  0x9b   :  { %v162_v16 = vadd.f32 %v277_v14, %v161_v15 }
  0x9d   :  { %167 = vst.msk [vmem:[#allocation11] sm:$0xff] %vm104_vm0, %v162_v16 }
  0x9e   :  { %v128_v19 = vpop.f32.mrf.mxu0 }
  0x9f   :  { %v194_v20 = vpop.f32.mrf.mxu2  ;;  %v129_v21 = vadd.f32 %v279_v17, %v128_v19 }
  0xa0   :  { %v195_v22 = vadd.f32 %v278_v18, %v194_v20 }
  0xa1   :  { %134 = vst.msk [vmem:[#allocation10] sm:$0xff] %vm104_vm0, %v129_v21  ;;  %v131_v23 = vpop.f32.mrf.mxu3 }
  0xa2   :  { %200 = vst.msk [vmem:[#allocation13] sm:$0xff] %vm104_vm0, %v195_v22  ;;  %v164_v24 = vpop.f32.mrf.mxu1  ;;  %v132_v25 = vadd.f32 %v279_v17, %v131_v23 }
  0xa3   :  { %v165_v26 = vadd.f32 %v277_v14, %v164_v24 }
  0xa4   :  { %135 = vst.msk [vmem:[#allocation10 + $0x8] sm:$0xff] %vm104_vm0, %v132_v25 }
  0xa5   :  { %168 = vst.msk [vmem:[#allocation11 + $0x8] sm:$0xff] %vm104_vm0, %v165_v26  ;;  %214 = dma.vmem_to_hbm [thread:$0]  %s207_s13, 256, %s209_s5, [#allocation4], %s459_s17, %s459_s17, %s460_s18  }
  0xa6   :  { %227 = dma.vmem_to_hbm [thread:$0]  %s220_s19, 256, %s222_s21, [#allocation12], %s459_s17, %s459_s17, %s460_s18  }
  0xa7   :  { %v197_v27 = vpop.f32.mrf.mxu2 }
  0xa8   :  { %v198_v28 = vadd.f32 %v278_v18, %v197_v27 }
  0xaa   :  { %201 = vst.msk [vmem:[#allocation13 + $0x8] sm:$0xff] %vm104_vm0, %v198_v28 }
  0xab   :  { %240 = dma.vmem_to_hbm [thread:$0]  %s233_s7, 256, %s235_s8, [#allocation12], %s459_s17, %s459_s17, %s460_s18  }
  0xac   :  { %454 = dma.done.wait [#allocation4], 256  }
  0xad   :  { %455 = vsyncadd [#allocation4], 4294967040 }
  0xae   :  { %456 = dma.done.wait [#allocation12], 512  }
  0xaf   :  { %457 = vsyncadd [#allocation12], 4294966784 }
  0xb0   :  { %253 = vsyncpa [#allocation3], 1 }
  0xb1   :  { %254 = vsyncpa [#allocation6], 1 }
  0xb2   :  { %255 = vsyncpa [#allocation9], 1 }
  0xb3   :  { %256 = vsyncpa [#allocation4], 1 }
  0xb4   :  { %257 = vsyncpa [#allocation12], 1 }

</bundles_post_ra>
